<compile_context>
chip_gen: v6e
topology: v6e:2x2x1
jax: 0.10.0
libtpu: 0.0.40
codegen_flags: <defaults>
</compile_context>

<pallas_src>
import functools
import math

import jax
import jax.numpy as jnp
import numpy as np
from jax.experimental import pallas as pl
from jax.experimental.pallas import tpu as pltpu

LN_EPS = 1e-5          # nn.LayerNorm default
NEG_INF = -1e30        # large finite negative (avoids (-inf) - (-inf) = NaN)


def _layernorm(x, gamma, beta):
    # PyTorch LayerNorm: biased variance over the last dim.
    mean = jnp.mean(x, axis=-1, keepdims=True)
    var = jnp.mean((x - mean) ** 2, axis=-1, keepdims=True)
    inv = jax.lax.rsqrt(var + LN_EPS)
    return (x - mean) * inv * gamma + beta


# --------------------------- pass 1: LN1 + QKV projection ---------------------------
def _ln_qkv_kernel(x_ref, g_ref, b_ref, wqkv_ref, qkv_ref):
    x = x_ref[0]                                                 # (TQ, E)
    xn = _layernorm(x, g_ref[...], b_ref[...])
    qkv = jnp.dot(xn, wqkv_ref[...], preferred_element_type=jnp.float32)
    qkv_ref[0] = qkv.astype(qkv_ref.dtype)                       # lane dim = 3E


# ------------- pass 2: flash attention + out-proj + residual + LN2 + FFN -------------
def _attn_ffn_kernel(x_ref, qkvq_ref, qkvk_ref, wo_ref, g2_ref, b2_ref,
                     w1_ref, bias1_ref, w2_ref, bias2_ref, o_ref,
                     m_scr, l_scr, acc_scr, *, num_heads, activation):
    TQ, E = x_ref.shape[1], x_ref.shape[2]
    TKV = qkvk_ref.shape[1]
    H = num_heads
    hd = E // H

    qi = pl.program_id(1)
    ki = pl.program_id(2)
    q_start = qi * TQ
    kv_start = ki * TKV

    @pl.when(ki == 0)
    def _():
        m_scr[...] = jnp.full_like(m_scr, NEG_INF)
        l_scr[...] = jnp.zeros_like(l_scr)
        acc_scr[...] = jnp.zeros_like(acc_scr)

    def _split_heads(mat, col0):
        # (T, 3E) slice -> head-major (H, T, hd) via static lane slices + stack.
        return jnp.stack(
            [mat[:, col0 + h * hd: col0 + (h + 1) * hd] for h in range(H)], axis=0)

    # Skip KV tiles that lie entirely above the causal diagonal for this q-tile.
    @pl.when(kv_start <= q_start + (TQ - 1))
    def _():
        scale = 1.0 / math.sqrt(hd)
        qkv_q = qkvq_ref[0]                                      # (TQ, 3E)
        qkv_k = qkvk_ref[0]                                      # (TKV, 3E)
        q = _split_heads(qkv_q, 0) * scale                       # (H, TQ, hd)
        k = _split_heads(qkv_k, E)                               # (H, TKV, hd)
        v = _split_heads(qkv_k, 2 * E)                           # (H, TKV, hd)

        # scores: one batched MXU matmul, K-transpose folded into dot_general.
        s = jax.lax.dot_general(
            q, k, dimension_numbers=(((2,), (2,)), ((0,), (0,))),
            preferred_element_type=jnp.float32)                  # (H, TQ, TKV)

        # per-tile causal mask (finite negative bias, broadcast over heads)
        row = jax.lax.broadcasted_iota(jnp.int32, (TQ, TKV), 0) + q_start
        col = jax.lax.broadcasted_iota(jnp.int32, (TQ, TKV), 1) + kv_start
        bias = jnp.where(row >= col, 0.0, NEG_INF).astype(jnp.float32)
        s = s + bias[None, :, :]

        # online softmax update
        m_prev = m_scr[...]                                      # (H, TQ, 1)
        m_new = jnp.maximum(m_prev, jnp.max(s, axis=-1, keepdims=True))
        alpha = jnp.exp(m_prev - m_new)
        p = jnp.exp(s - m_new)                                   # (H, TQ, TKV)
        l_scr[...] = alpha * l_scr[...] + jnp.sum(p, axis=-1, keepdims=True)
        pv = jax.lax.dot_general(
            p, v, dimension_numbers=(((2,), (1,)), ((0,), (0,))),
            preferred_element_type=jnp.float32)                  # (H, TQ, hd)
        acc_scr[...] = alpha * acc_scr[...] + pv
        m_scr[...] = m_new

    @pl.when(ki == pl.num_programs(2) - 1)
    def _():
        x = x_ref[0]                                             # (TQ, E)
        inv_l = pl.reciprocal(l_scr[...], approx=True)           # EUP slot
        att = acc_scr[...] * inv_l                               # (H, TQ, hd)
        att = jnp.concatenate([att[h] for h in range(H)], axis=-1)   # (TQ, E)
        att = jnp.dot(att, wo_ref[...], preferred_element_type=jnp.float32)
        x1 = x + att                                             # residual 1

        xn2 = _layernorm(x1, g2_ref[...], b2_ref[...])
        h1 = jnp.dot(xn2, w1_ref[...], preferred_element_type=jnp.float32) + bias1_ref[...]
        if activation == "relu":
            h1 = jnp.maximum(h1, 0.0)
        elif activation == "gelu":
            h1 = jax.nn.gelu(h1, approximate=False)              # nn.GELU default
        else:
            raise AssertionError(f"{activation} activation not supported")
        h2 = jnp.dot(h1, w2_ref[...], preferred_element_type=jnp.float32) + bias2_ref[...]

        # dropout p=0.0 -> identity
        o_ref[0] = (x1 + h2).astype(o_ref.dtype)                 # residual 2


# ------------------------------------ wrapper ----------------------------------------
def _const_index_map(grid_rank, block_rank):
    zeros = (0,) * block_rank
    if grid_rank == 2:
        return lambda b, i: zeros
    return lambda b, i, j: zeros


def _weight_spec(shape, grid_rank, single_buffer):
    imap = _const_index_map(grid_rank, len(shape))
    if single_buffer:
        # invariant blocks: a single VMEM buffer is enough (halves weight footprint)
        return pl.BlockSpec(shape, imap, pipeline_mode=pl.Buffered(buffer_count=1))
    return pl.BlockSpec(shape, imap)


def _forward(x, params, *, num_heads, activation, tq, tkv, single_buffer_weights):
    B, S, E = x.shape
    Fh = params["w1"].shape[1]
    H = num_heads
    hd = E // H
    n_q, n_kv = S // tq, S // tkv

    def wspec(grid_rank, *shape):
        return _weight_spec(shape, grid_rank, single_buffer_weights)

    # ---- pass 1: LN1 + QKV projection, grid (batch, row tiles) ----
    qkv = pl.pallas_call(
        _ln_qkv_kernel,
        out_shape=jax.ShapeDtypeStruct((B, S, 3 * E), jnp.float32),
        grid=(B, n_q),
        in_specs=[
            pl.BlockSpec((1, tq, E), lambda b, i: (b, i, 0)),
            wspec(2, 1, E), wspec(2, 1, E), wspec(2, E, 3 * E),
        ],
        out_specs=pl.BlockSpec((1, tq, 3 * E), lambda b, i: (b, i, 0)),
        compiler_params=pltpu.CompilerParams(
            dimension_semantics=("parallel", "parallel")),
        cost_estimate=pl.CostEstimate(
            flops=2 * B * S * E * 3 * E,
            transcendentals=B * S,
            bytes_accessed=4 * (B * S * E + B * S * 3 * E + E * 3 * E + 2 * E)),
    )(x, params["ln1_g"], params["ln1_b"], params["wqkv"])

    # ---- pass 2: flash attention over KV tiles + fused epilogue ----
    kernel = functools.partial(_attn_ffn_kernel, num_heads=H, activation=activation)
    out = pl.pallas_call(
        kernel,
        out_shape=jax.ShapeDtypeStruct((B, S, E), x.dtype),
        grid=(B, n_q, n_kv),
        in_specs=[
            pl.BlockSpec((1, tq, E), lambda b, qi, ki: (b, qi, 0)),       # x (residual)
            pl.BlockSpec((1, tq, 3 * E), lambda b, qi, ki: (b, qi, 0)),   # qkv -> Q rows
            pl.BlockSpec((1, tkv, 3 * E), lambda b, qi, ki: (b, ki, 0)),  # qkv -> K/V rows
            wspec(3, E, E),                                               # out_proj
            wspec(3, 1, E), wspec(3, 1, E),                               # ln2
            wspec(3, E, Fh), wspec(3, 1, Fh), wspec(3, Fh, E), wspec(3, 1, E),  # ffn
        ],
        out_specs=pl.BlockSpec((1, tq, E), lambda b, qi, ki: (b, qi, 0)),
        scratch_shapes=[
            pltpu.VMEM((H, tq, 1), jnp.float32),    # running max
            pltpu.VMEM((H, tq, 1), jnp.float32),    # running denominator
            pltpu.VMEM((H, tq, hd), jnp.float32),   # output accumulator
        ],
        compiler_params=pltpu.CompilerParams(
            dimension_semantics=("parallel", "parallel", "arbitrary")),
        cost_estimate=pl.CostEstimate(
            flops=4 * B * S * S * E + 2 * B * S * E * E + 4 * B * S * E * Fh,
            transcendentals=B * H * S * S + 2 * B * S,
            bytes_accessed=4 * (2 * B * S * E + B * S * 3 * E * (1 + n_kv)
                                + E * E + 2 * E * Fh + 2 * Fh + 4 * E)),
    )(x, qkv, qkv, params["wo"], params["ln2_g"], params["ln2_b"],
      params["w1"], params["b1"], params["w2"], params["b2"])

    return jax.block_until_ready(out)


def transformer_block(x, params, *, num_heads, activation, tq=None, tkv=None):
    B, S, E = x.shape
    assert E % num_heads == 0
    if tq is None:
        tq = min(S, 128)
    if tkv is None:
        tkv = min(S, 128)
    assert S % tq == 0 and S % tkv == 0, "seq len must be divisible by tile sizes"
    assert (tq % 8 == 0 or tq == S) and (tkv % 8 == 0 or tkv == S)

    # Try single-buffered invariant weights first; fall back to default double
    # buffering if this JAX version does not support pl.Buffered(1) here.
    try:
        return _forward(x, params, num_heads=num_heads, activation=activation,
                        tq=tq, tkv=tkv, single_buffer_weights=True)
    except Exception:
        return _forward(x, params, num_heads=num_heads, activation=activation,
                        tq=tq, tkv=tkv, single_buffer_weights=False)


# ------------------------------------ reference --------------------------------------
def reference(x, params, *, num_heads, activation):
    """Pure-JAX reference mirroring the PyTorch forward (eval mode, dropout=0)."""
    def ln(y, g, b):
        m = y.mean(-1, keepdims=True)
        v = ((y - m) ** 2).mean(-1, keepdims=True)
        return (y - m) / jnp.sqrt(v + LN_EPS) * g + b

    B, S, E = x.shape
    hd = E // num_heads
    xn = ln(x, params["ln1_g"], params["ln1_b"])
    qkv = xn @ params["wqkv"]
    q, k, v = jnp.split(qkv, 3, axis=-1)
    q = q.reshape(B, S, num_heads, hd).transpose(0, 2, 1, 3)
    k = k.reshape(B, S, num_heads, hd).transpose(0, 2, 1, 3)
    v = v.reshape(B, S, num_heads, hd).transpose(0, 2, 1, 3)
    s = jnp.einsum("bhqd,bhkd->bhqk", q, k) / jnp.sqrt(jnp.float32(hd))
    mask = jnp.tril(jnp.ones((S, S), bool))
    s = jnp.where(mask, s, -jnp.inf)
    p = jax.nn.softmax(s, axis=-1)
    att = jnp.einsum("bhqk,bhkd->bhqd", p, v).transpose(0, 2, 1, 3).reshape(B, S, E)
    x1 = x + att @ params["wo"]
    xn2 = ln(x1, params["ln2_g"], params["ln2_b"])
    h = xn2 @ params["w1"] + params["b1"]
    if activation == "relu":
        h = jnp.maximum(h, 0.0)
    else:
        h = jax.nn.gelu(h, approximate=False)
    return x1 + h @ params["w2"] + params["b2"]


if __name__ == "__main__":
    # TransformerBlock(embed_dim=32, num_heads=4, attn_bias=False,
    #                  linear_expansion_factor=4, activation='relu', dropout=0.0)
    B, S, E = 2, 16, 32
    num_heads, expansion, activation = 4, 4, "relu"
    Fh = expansion * E

    key = jax.random.PRNGKey(0)
    kx, k0, k1, k2, k3, k4, k5, k6, k7, k8, k9 = jax.random.split(key, 11)
    params = {
        "ln1_g": 1.0 + 0.1 * jax.random.normal(k0, (1, E), jnp.float32),
        "ln1_b": 0.1 * jax.random.normal(k1, (1, E), jnp.float32),
        "wqkv": 0.1 * jax.random.normal(k2, (E, 3 * E), jnp.float32),
        "wo":   0.1 * jax.random.normal(k3, (E, E), jnp.float32),
        "ln2_g": 1.0 + 0.1 * jax.random.normal(k4, (1, E), jnp.float32),
        "ln2_b": 0.1 * jax.random.normal(k5, (1, E), jnp.float32),
        "w1":   0.1 * jax.random.normal(k6, (E, Fh), jnp.float32),
        "b1":   0.1 * jax.random.normal(k7, (1, Fh), jnp.float32),
        "w2":   0.1 * jax.random.normal(k8, (Fh, E), jnp.float32),
        "b2":   0.1 * jax.random.normal(k9, (1, E), jnp.float32),
    }
    x = jax.random.normal(kx, (B, S, E), jnp.float32)

    # tq=tkv=8 -> 2 q-tiles x 2 kv-tiles: exercises the online-softmax reduction,
    # the causal block-skip and the init/finalize paths of the flash kernel.
    out = transformer_block(x, params, num_heads=num_heads, activation=activation,
                            tq=8, tkv=8)
    out = jax.block_until_ready(out)

    ref = reference(x, params, num_heads=num_heads, activation=activation)
    # tolerance slightly looser than f32-exact because the softmax denominator uses
    # the EUP approximate reciprocal (pl.reciprocal(approx=True)).
    np.testing.assert_allclose(np.asarray(out), np.asarray(ref), rtol=2e-3, atol=2e-3)

    print("KERNEL_OK")
</pallas_src>

<mosaic_0001>
module attributes {stable_mosaic.version = 11 : i64} {
  func.func @_ln_qkv_kernel(%arg0: i32, %arg1: i32, %arg2: memref<1x8x32xf32, #tpu.memory_space<vmem>>, %arg3: memref<1x32xf32, #tpu.memory_space<vmem>>, %arg4: memref<1x32xf32, #tpu.memory_space<vmem>>, %arg5: memref<32x96xf32, #tpu.memory_space<vmem>>, %arg6: memref<1x8x96xf32, #tpu.memory_space<vmem>>) attributes {dimension_semantics = [#tpu.dimension_semantics<parallel>, #tpu.dimension_semantics<parallel>], iteration_bounds = array<i64: 2, 2>, scalar_prefetch = 0 : i64, scratch_operands = 0 : i64, tpu.core_type = #tpu.core_type<tc>, window_params = [{transform_indices = @transform_0, window_bounds = array<i64: 1, 8, 32>}, {pipeline_mode = #tpu.pipeline_mode<synchronous>, transform_indices = @transform_1, window_bounds = array<i64: 1, 32>}, {pipeline_mode = #tpu.pipeline_mode<synchronous>, transform_indices = @transform_2, window_bounds = array<i64: 1, 32>}, {pipeline_mode = #tpu.pipeline_mode<synchronous>, transform_indices = @transform_3, window_bounds = array<i64: 32, 96>}, {transform_indices = @transform_4, window_bounds = array<i64: 1, 8, 96>}]} {
    %c0 = arith.constant 0 : index
    %c0_0 = arith.constant 0 : index
    %c0_1 = arith.constant 0 : index
    %0 = vector.load %arg2[%c0, %c0_0, %c0_1] : memref<1x8x32xf32, #tpu.memory_space<vmem>>, vector<1x8x32xf32>
    %1 = vector.shape_cast %0 : vector<1x8x32xf32> to vector<8x32xf32>
    %c0_2 = arith.constant 0 : index
    %c0_3 = arith.constant 0 : index
    %2 = vector.load %arg3[%c0_2, %c0_3] : memref<1x32xf32, #tpu.memory_space<vmem>>, vector<1x32xf32>
    %c0_4 = arith.constant 0 : index
    %c0_5 = arith.constant 0 : index
    %3 = vector.load %arg4[%c0_4, %c0_5] : memref<1x32xf32, #tpu.memory_space<vmem>>, vector<1x32xf32>
    %cst = arith.constant dense<0.000000e+00> : vector<8xf32>
    %4 = vector.multi_reduction <add>, %1, %cst [1] : vector<8x32xf32> to vector<8xf32>
    %5 = vector.shape_cast %4 : vector<8xf32> to vector<8x1xf32>
    %cst_6 = arith.constant 3.200000e+01 : f32
    %6 = vector.broadcast %cst_6 : f32 to vector<8x1xf32>
    %7 = arith.divf %5, %6 : vector<8x1xf32>
    %8 = vector.broadcast %7 : vector<8x1xf32> to vector<8x32xf32>
    %9 = arith.subf %1, %8 : vector<8x32xf32>
    %10 = arith.mulf %9, %9 : vector<8x32xf32>
    %cst_7 = arith.constant dense<0.000000e+00> : vector<8xf32>
    %11 = vector.multi_reduction <add>, %10, %cst_7 [1] : vector<8x32xf32> to vector<8xf32>
    %12 = vector.shape_cast %11 : vector<8xf32> to vector<8x1xf32>
    %cst_8 = arith.constant 3.200000e+01 : f32
    %13 = vector.broadcast %cst_8 : f32 to vector<8x1xf32>
    %14 = arith.divf %12, %13 : vector<8x1xf32>
    %cst_9 = arith.constant 9.99999974E-6 : f32
    %15 = vector.broadcast %cst_9 : f32 to vector<8x1xf32>
    %16 = arith.addf %14, %15 : vector<8x1xf32>
    %17 = math.rsqrt %16 : vector<8x1xf32>
    %18 = vector.broadcast %7 : vector<8x1xf32> to vector<8x32xf32>
    %19 = arith.subf %1, %18 : vector<8x32xf32>
    %20 = vector.broadcast %17 : vector<8x1xf32> to vector<8x32xf32>
    %21 = arith.mulf %19, %20 : vector<8x32xf32>
    %22 = vector.broadcast %2 : vector<1x32xf32> to vector<8x32xf32>
    %23 = arith.mulf %21, %22 : vector<8x32xf32>
    %24 = vector.broadcast %3 : vector<1x32xf32> to vector<8x32xf32>
    %25 = arith.addf %23, %24 : vector<8x32xf32>
    %c0_10 = arith.constant 0 : index
    %c0_11 = arith.constant 0 : index
    %26 = vector.load %arg5[%c0_10, %c0_11] : memref<32x96xf32, #tpu.memory_space<vmem>>, vector<32x96xf32>
    %cst_12 = arith.constant dense<0.000000e+00> : vector<8x96xf32>
    %27 = tpu.matmul %25, %26, %cst_12 {dimension_numbers = #tpu.dot_dimension_numbers<[1], [0], [0], [1], [0, 0, 1, 1], [], []>} : vector<8x32xf32>, vector<32x96xf32>, vector<8x96xf32> -> vector<8x96xf32>
    %c0_13 = arith.constant 0 : index
    %c0_14 = arith.constant 0 : index
    %c0_15 = arith.constant 0 : index
    %28 = vector.load %arg6[%c0_13, %c0_14, %c0_15] : memref<1x8x96xf32, #tpu.memory_space<vmem>>, vector<1x8x96xf32>
    %29 = vector.shape_cast %28 : vector<1x8x96xf32> to vector<8x96xf32>
    %30 = vector.shape_cast %27 : vector<8x96xf32> to vector<1x8x96xf32>
    tpu.vector_store %arg6[%c0_13, %c0_14, %c0_15], %30 {strides = array<i32>} : memref<1x8x96xf32, #tpu.memory_space<vmem>>, vector<1x8x96xf32>,
    return
  }
  func.func @transform_0(%arg0: i32, %arg1: i32) -> (i32, i32, i32) {
    %c0_i32 = arith.constant 0 : i32
    %c0_i32_0 = arith.constant 0 : i32
    return %arg0, %arg1, %c0_i32 : i32, i32, i32
  }
  func.func @transform_1(%arg0: i32, %arg1: i32) -> (i32, i32) {
    %c0_i32 = arith.constant 0 : i32
    %c0_i32_0 = arith.constant 0 : i32
    %c0_i32_1 = arith.constant 0 : i32
    return %c0_i32, %c0_i32_0 : i32, i32
  }
  func.func @transform_2(%arg0: i32, %arg1: i32) -> (i32, i32) {
    %c0_i32 = arith.constant 0 : i32
    %c0_i32_0 = arith.constant 0 : i32
    %c0_i32_1 = arith.constant 0 : i32
    return %c0_i32, %c0_i32_0 : i32, i32
  }
  func.func @transform_3(%arg0: i32, %arg1: i32) -> (i32, i32) {
    %c0_i32 = arith.constant 0 : i32
    %c0_i32_0 = arith.constant 0 : i32
    %c0_i32_1 = arith.constant 0 : i32
    return %c0_i32, %c0_i32_0 : i32, i32
  }
  func.func @transform_4(%arg0: i32, %arg1: i32) -> (i32, i32, i32) {
    %c0_i32 = arith.constant 0 : i32
    %c0_i32_0 = arith.constant 0 : i32
    return %arg0, %arg1, %c0_i32 : i32, i32, i32
  }
}

module attributes {stable_mosaic.version = 11 : i64} {
  func.func @_ln_qkv_kernel(%arg0: i32, %arg1: i32, %arg2: memref<1x8x32xf32, #tpu.memory_space<vmem>>, %arg3: memref<1x32xf32, #tpu.memory_space<vmem>>, %arg4: memref<1x32xf32, #tpu.memory_space<vmem>>, %arg5: memref<32x96xf32, #tpu.memory_space<vmem>>, %arg6: memref<1x8x96xf32, #tpu.memory_space<vmem>>) attributes {dimension_semantics = [#tpu.dimension_semantics<parallel>, #tpu.dimension_semantics<parallel>], iteration_bounds = array<i64: 2, 2>, scalar_prefetch = 0 : i64, scratch_operands = 0 : i64, tpu.core_type = #tpu.core_type<tc>, window_params = [{transform_indices = @transform_0, window_bounds = array<i64: 1, 8, 32>}, {pipeline_mode = #tpu.pipeline_mode<synchronous>, transform_indices = @transform_1, window_bounds = array<i64: 1, 32>}, {pipeline_mode = #tpu.pipeline_mode<synchronous>, transform_indices = @transform_2, window_bounds = array<i64: 1, 32>}, {pipeline_mode = #tpu.pipeline_mode<synchronous>, transform_indices = @transform_3, window_bounds = array<i64: 32, 96>}, {transform_indices = @transform_4, window_bounds = array<i64: 1, 8, 96>}]} {
    %c0 = arith.constant 0 : index
    %c0_0 = arith.constant 0 : index
    %c0_1 = arith.constant 0 : index
    %0 = vector.load %arg2[%c0, %c0_0, %c0_1] : memref<1x8x32xf32, #tpu.memory_space<vmem>>, vector<1x8x32xf32>
    %1 = vector.shape_cast %0 : vector<1x8x32xf32> to vector<8x32xf32>
    %c0_2 = arith.constant 0 : index
    %c0_3 = arith.constant 0 : index
    %2 = vector.load %arg3[%c0_2, %c0_3] : memref<1x32xf32, #tpu.memory_space<vmem>>, vector<1x32xf32>
    %c0_4 = arith.constant 0 : index
    %c0_5 = arith.constant 0 : index
    %3 = vector.load %arg4[%c0_4, %c0_5] : memref<1x32xf32, #tpu.memory_space<vmem>>, vector<1x32xf32>
    %cst = arith.constant dense<0.000000e+00> : vector<8xf32>
    %4 = vector.multi_reduction <add>, %1, %cst [1] : vector<8x32xf32> to vector<8xf32>
    %5 = vector.shape_cast %4 : vector<8xf32> to vector<8x1xf32>
    %cst_6 = arith.constant 3.200000e+01 : f32
    %6 = vector.broadcast %cst_6 : f32 to vector<8x1xf32>
    %7 = arith.divf %5, %6 : vector<8x1xf32>
    %8 = vector.broadcast %7 : vector<8x1xf32> to vector<8x32xf32>
    %9 = arith.subf %1, %8 : vector<8x32xf32>
    %10 = arith.mulf %9, %9 : vector<8x32xf32>
    %cst_7 = arith.constant dense<0.000000e+00> : vector<8xf32>
    %11 = vector.multi_reduction <add>, %10, %cst_7 [1] : vector<8x32xf32> to vector<8xf32>
    %12 = vector.shape_cast %11 : vector<8xf32> to vector<8x1xf32>
    %cst_8 = arith.constant 3.200000e+01 : f32
    %13 = vector.broadcast %cst_8 : f32 to vector<8x1xf32>
    %14 = arith.divf %12, %13 : vector<8x1xf32>
    %cst_9 = arith.constant 9.99999974E-6 : f32
    %15 = vector.broadcast %cst_9 : f32 to vector<8x1xf32>
    %16 = arith.addf %14, %15 : vector<8x1xf32>
    %17 = math.rsqrt %16 : vector<8x1xf32>
    %18 = vector.broadcast %7 : vector<8x1xf32> to vector<8x32xf32>
    %19 = arith.subf %1, %18 : vector<8x32xf32>
    %20 = vector.broadcast %17 : vector<8x1xf32> to vector<8x32xf32>
    %21 = arith.mulf %19, %20 : vector<8x32xf32>
    %22 = vector.broadcast %2 : vector<1x32xf32> to vector<8x32xf32>
    %23 = arith.mulf %21, %22 : vector<8x32xf32>
    %24 = vector.broadcast %3 : vector<1x32xf32> to vector<8x32xf32>
    %25 = arith.addf %23, %24 : vector<8x32xf32>
    %c0_10 = arith.constant 0 : index
    %c0_11 = arith.constant 0 : index
    %26 = vector.load %arg5[%c0_10, %c0_11] : memref<32x96xf32, #tpu.memory_space<vmem>>, vector<32x96xf32>
    %cst_12 = arith.constant dense<0.000000e+00> : vector<8x96xf32>
    %27 = tpu.matmul %25, %26, %cst_12 {dimension_numbers = #tpu.dot_dimension_numbers<[1], [0], [0], [1], [0, 0, 1, 1], [], []>} : vector<8x32xf32>, vector<32x96xf32>, vector<8x96xf32> -> vector<8x96xf32>
    %c0_13 = arith.constant 0 : index
    %c0_14 = arith.constant 0 : index
    %c0_15 = arith.constant 0 : index
    %28 = vector.load %arg6[%c0_13, %c0_14, %c0_15] : memref<1x8x96xf32, #tpu.memory_space<vmem>>, vector<1x8x96xf32>
    %29 = vector.shape_cast %28 : vector<1x8x96xf32> to vector<8x96xf32>
    %30 = vector.shape_cast %27 : vector<8x96xf32> to vector<1x8x96xf32>
    tpu.vector_store %arg6[%c0_13, %c0_14, %c0_15], %30 {strides = array<i32>} : memref<1x8x96xf32, #tpu.memory_space<vmem>>, vector<1x8x96xf32>,
    return
  }
  func.func @transform_0(%arg0: i32, %arg1: i32) -> (i32, i32, i32) {
    %c0_i32 = arith.constant 0 : i32
    %c0_i32_0 = arith.constant 0 : i32
    return %arg0, %arg1, %c0_i32 : i32, i32, i32
  }
  func.func @transform_1(%arg0: i32, %arg1: i32) -> (i32, i32) {
    %c0_i32 = arith.constant 0 : i32
    %c0_i32_0 = arith.constant 0 : i32
    %c0_i32_1 = arith.constant 0 : i32
    return %c0_i32, %c0_i32_0 : i32, i32
  }
  func.func @transform_2(%arg0: i32, %arg1: i32) -> (i32, i32) {
    %c0_i32 = arith.constant 0 : i32
    %c0_i32_0 = arith.constant 0 : i32
    %c0_i32_1 = arith.constant 0 : i32
    return %c0_i32, %c0_i32_0 : i32, i32
  }
  func.func @transform_3(%arg0: i32, %arg1: i32) -> (i32, i32) {
    %c0_i32 = arith.constant 0 : i32
    %c0_i32_0 = arith.constant 0 : i32
    %c0_i32_1 = arith.constant 0 : i32
    return %c0_i32, %c0_i32_0 : i32, i32
  }
  func.func @transform_4(%arg0: i32, %arg1: i32) -> (i32, i32, i32) {
    %c0_i32 = arith.constant 0 : i32
    %c0_i32_0 = arith.constant 0 : i32
    return %arg0, %arg1, %c0_i32 : i32, i32, i32
  }
}

</mosaic_0001>

<bundles_post_ra>
// kernel: tpu_custom_call.1
= control target key start
LH: loop header
LB: loop body
LE: loop exit
PB: predicated region body
PF: predicated region fallthrough
CT: control target
= control target key end

     0   :  { %s995_s0 = inlined_call_operand.hbm [shape: f32[2,16,32], index: 0, kind: input, shape index: {}]   ;;  %s996_s1 = inlined_call_operand.vmem [shape: f32[1,32], index: 1, kind: input, shape index: {}]   ;;  %s997_s2 = inlined_call_operand.vmem [shape: f32[1,32], index: 2, kind: input, shape index: {}]   ;;  %s998_s3 = inlined_call_operand.hbm [shape: f32[32,96], index: 3, kind: input, shape index: {}]   ;;  %s999_s4 = inlined_call_operand.hbm [shape: f32[2,16,96], index: 4, kind: output, shape index: {}]  }
   0x1   :  { %1007 = sst [smem:[#allocation15_spill]] %s998_s3 }
   0x2   :  { %1008 = sst [smem:[#allocation16_spill]] %s999_s4 }
   0x3   :  { %9 = vsyncpa [#allocation3], 0 }
   0x4   :  { %11 = vsyncpa [#allocation3 + $0x1], 0 }
   0x5   :  { %12 = vsyncpa [#allocation6], 0 }
   0x6   :  { %13 = vsyncpa [#allocation4], 0 }
   0x7   :  { %15 = vsyncpa [#allocation4 + $0x1], 0  ;;  %s787_s15 = smov 0   ;;  %s789_s16 = smov 0  }
   0x8   :  { %s791_s17 = smov 0   ;;  %s793_s18 = smov 0  }
   0x9   :  { %s795_s19 = smov 0   ;;  %s797_s20 = smov 0  }
   0xa   :  { %s799_s21 = smov 0   ;;  %s801_s22 = smov 0  }
   0xb LB: > { %1009 = sst [smem:[#allocation11_spill]] %s725_s15  ;;  %s468_s23 = sadd.s32 4294967295, %s753_s22   ;;  %s753_s22 = sphi %s801_s22, %s21_s22   ;;  %s749_s21 = sphi %s799_s21, %s1035_s21   ;;  %s745_s20 = sphi %s797_s20, %s1034_s20   ;;  %s741_s19 = sphi %s795_s19, %s1033_s19   ;;  %s737_s18 = sphi %s793_s18, %s1032_s18   ;;  %s733_s17 = sphi %s791_s17, %s1031_s17   ;;  %s729_s16 = sphi %s789_s16, %s1030_s16   ;;  %s725_s15 = sphi %s787_s15, %s1029_s15  }
   0xc   : > { %s469_s24 = sadd.s32 4294967294, %s753_s22   ;;  %p55_p0 = scmp.ne.s32.totalorder %s729_s16, %s725_s15 }
   0xd   : > { %p831_p1 = scmp.eq.s32.totalorder %s468_s23, 0  ;;  %p835_p2 = scmp.eq.s32.totalorder %s468_s23, 3 }
   0xe   : > { %p150_p3 = scmp.eq.s32.totalorder %s469_s24, 3  ;;  %p470_p5 = scmp.ge.s32.totalorder %s753_s22, 1 }
   0xf   : > { %p841_p4 = por %p831_p1, %p55_p0  ;;  %p157_p7 = scmp.lt.s32.totalorder %s753_s22, 5 }
  0x10   : > { %p846_p6 = por %p150_p3, %p55_p0  ;;  %s755_s30 = smov [#allocation5]  }
  0x11   : > { %s1012_s27 = scalar_select %p841_p4, 1, 0 }
  0x12   : > { %s1013_s28 = scalar_select %p846_p6, 1, 0 }
  0x13   : > { %p851_p8 = pnand %p470_p5, %p157_p7  ;;  %s175_s5 = sshll.u32 %s755_s30, 4  ;;  %s176_s5 = int_to_ptr.vmem [resolvable:$true] %s175_s5 }
  0x14   : > { %1014 = sst [smem:[#allocation12_spill]] %s1013_s28  ;;  %s610_s6 = scalar_lea.vmem %s176_s5, 512 }
  0x15   : > { %p512_p9 = pneg %p851_p8  ;;  %p611_p12 = scmp.ne.s32.totalorder %s176_s5, %s610_s6 }
  0x16   : > { %p618_p3 = scmp.lt.s32.totalorder %s176_s5, %s176_s5  ;;  %p619_p6 = scmp.lt.s32.totalorder %s610_s6, %s610_s6 }
  0x17   : > { %p513_p10 = pnand %p512_p9, %p831_p1 }
  0x18   : > { %p620_p4 = por %p619_p6, %p618_p3 }
  0x19   : > { %p601_p11 = pneg %p513_p10 }
  0x1b   : > { %p613_p13 = pnand %p611_p12, %p601_p11 }
  0x1d   : > { %p614_p0 = pneg %p613_p13 }
  0x1f   : > { %p621_p5 = pnand %p620_p4, %p614_p0 }
  0x21   : > { %624 = shalt.err (!%p621_p5)
}
  0x22   : > { %s756_s7 = smov 128   ;;  %s757_s8 = smov 8  }
  0x23   : > { %s1016_s3 = sld [smem:[#allocation15_spill]]  ;;  %s30_s11 = sadd.s32 1, %s745_s20 }
  0x24   : > { %p31_p4 = scmp.ge.s32.totalorder %s30_s11, 2  ;;  %s33_s12 = sadd.s32 1, %s749_s21 }
  0x25   : > { %s42_s13 = sadd.s32 1, %s733_s17  ;;  %p49_p6 = scmp.ne.s32.totalorder %s733_s17, %s729_s16 }
  0x26   : > { %s1037_s11 = smov (%p31_p4, %s30_s11), 0  ;;  %s1039_s12 = smov (!%p31_p4, %s33_s12), %s749_s21 }
  0x27   : > { %1017 = sst [smem:[#allocation13_spill]] %s1037_s11  ;;  %s38_s14 = ssub.s32 %s745_s20, %s1037_s11 }
  0x28   : > { %p50_p7 = scmp.eq.s32.totalorder %s753_s22, 0  ;;  %p35_p9 = scmp.ge.s32.totalorder %s1039_s12, 2 }
  0x29   : > { %515 = dma.hbm_to_vmem [thread:$0]  (!%p513_p10), %s1016_s3, 512, %s176_s5, [#allocation6], %s756_s7, %s756_s7, %s757_s8  }
  0x2a   : > { %p875_p11 = por %p835_p2, %p49_p6  ;;  %p879_p10 = por %p50_p7, %p49_p6 }
  0x2b   : > { %p525_p12 = scmp.lt.s32.totalorder %s753_s22, 4  ;;  %s1041_s12 = smov (%p35_p9, %s1039_s12), 0 }
  0x2c   : > { %s1018_s23 = scalar_select %p875_p11, 1, 0 }
  0x2d   : > { %s189_s30 = sand.u32 1, %s733_s17   ;;  %s474_s5 = sshll.u32 %s749_s21, 1 }
  0x2e   : > { %1019 = sst [smem:[#allocation14_spill]] %s1018_s23  ;;  %s37_s6 = ssub.s32 %s749_s21, %s1041_s12 }
  0x2f   : > { %s39_s7 = sor.u32 %s38_s14, %s37_s6  ;;  %s473_s8 = sshll.u32 %s189_s30, 3 }
  0x30   : > { %p40_p13 = scmp.eq.s32.totalorder %s39_s7, 0  ;;  %s198_s26 = sadd.s32 %s745_s20, %s474_s5 }
  0x31   : > { %s193_s9 = scalar_lea.vmem [#allocation2], %s473_s8  ;;  %s475_s11 = sshll.u32 %s198_s26, 7 }
  0x32   : > { %s202_s10 = sshll.u32 %s193_s9, 4  ;;  %s200_s4 = scalar_lea.hbm %s995_s0, %s475_s11  ;;  %s203_s10 = int_to_ptr.vmem [resolvable:$true] %s202_s10 }
  0x33   : > { %s892_s3 = scalar_select %p40_p13, %s733_s17, %s42_s13  }
  0x34   : > { %p901_p2 = pnand %p525_p12, %p879_p10  ;;  %s190_s14 = scalar_lea.sflag [#allocation3], %s189_s30 }
  0x35   : > { %s638_s5 = scalar_lea.vmem %s203_s10, 128  ;;  %s758_s13 = smov [#allocation2]  }
  0x36   : > { %p627_p0 = pneg %p901_p2  ;;  %p639_p3 = scmp.ne.s32.totalorder %s203_s10, %s638_s5 }
  0x37   : > { %s643_s6 = sshll.u32 %s758_s13, 4  ;;  %s644_s6 = int_to_ptr.vmem [resolvable:$false] %s643_s6 }
  0x38   : > { %p641_p5 = pnand %p639_p3, %p627_p0  ;;  %s645_s7 = scalar_lea.vmem %s644_s6, 256 }
  0x39   : > { %p646_p6 = scmp.lt.s32.totalorder %s203_s10, %s644_s6  ;;  %p647_p7 = scmp.lt.s32.totalorder %s645_s7, %s638_s5 }
  0x3a   : > { %p642_p4 = pneg %p641_p5 }
  0x3b   : > { %p648_p9 = por %p647_p7, %p646_p6 }
  0x3d   : > { %p649_p13 = pnand %p648_p9, %p642_p4 }
  0x3f   : > { %652 = shalt.err (!%p649_p13)
}
  0x40   : > { %519 = dma.hbm_to_vmem [thread:$0]  (!%p901_p2), %s200_s4, 128, %s203_s10, %s190_s14  }
  0x41   : > { %211 = sbr.rel (%p851_p8) target bundleno = 589 (0x24d), region = 36  ;;  %s912_s15 = sand.u32 (!%p851_p8), 1, %s729_s16  }
  0x42   : > { %s477_s28 = sshll.u32 (!%p851_p8), %s912_s15, 3  ;;  %s214_s11 = scalar_lea.sflag (!%p851_p8), [#allocation3], %s912_s15 }
  0x43   : > { %s217_s24 = scalar_lea.vmem (!%p851_p8), [#allocation2], %s477_s28  ;;  %p1022_p10 = scmp.ne.s32.totalorder (!%p851_p8), %s1012_s27, 0 }
  0x46   : > { %712 = dma.done.wait (%p1022_p10), %s214_s11, 128  }
  0x47   : > { %714 = vsyncadd (%p1022_p10), %s214_s11, 4294967168 }
  0x48   : > { %716 = dma.done.wait (%p831_p1), [#allocation6], 512  }
  0x49   : > { %718 = vsyncadd (%p831_p1), [#allocation6], 4294966784  ;;  %vm249_vm0 = vcmask 261120   ;;  %v246_v0 = vld [vmem:[%s217_s24] sm:$0xff]  ;;  %v759_v8 = vmov 0.0   ;;  %vm760_vm1 = vmmov 0  }
  0x4a   : > { %v250_v1 = vsel %vm249_vm0, %v246_v0, 0.0  ;;  %v281_v7 = vld [vmem:[#allocation5 + $0x18] sm:$0xff]  ;;  %493 = vmatprep.subr.mxu0 %v759_v8  ;;  %v280_v9 = vld [vmem:[#allocation5 + $0x10] sm:$0xff]  ;;  %501 = vmatprep.mubr.msk.f32.mxu0 %vm760_vm1, %v759_v8  ;;  %v279_v10 = vld [vmem:[#allocation5 + $0x8] sm:$0xff]  ;;  %s484_s30 = sshll.u32 %s741_s19, 1  ;;  %s245_s9 = scalar_lea.vmem [#allocation7], %s477_s28 }
  0x4b   : > { %251 = vadd.xlane.f32.xlu0 %v250_v1  ;;  %494 = vmatpush3.msra.mxu0 %v281_v7  ;;  %v278_v11 = vld [vmem:[#allocation5] sm:$0xff]  ;;  %v480_v16 = vld [vmem:[%s996_s1] ss:$0 sm:$0xff]  ;;  %s369_s8 = sadd.s32 %s737_s18, %s484_s30  ;;  %s373_s10 = sshll.u32 %s245_s9, 4  ;;  %vm355_vm2 = vcmask 785408   ;;  %s944_s10 = int_to_ptr.vmem [resolvable:$true] %s373_s10 }
  0x4c   : > { %495 = vmatprep.subr.mxu0 %v759_v8  ;;  %v481_v18 = vld [vmem:[%s997_s2] ss:$0 sm:$0xff]  ;;  %s485_s26 = sshll.u32 %s369_s8, 7  ;;  %s1024_s13 = sld [smem:[#allocation16_spill]] }
  0x4d   : > { %496 = vmatpush3.msra.mxu0 %v280_v9  ;;  %s358_s19 = scalar_lea.sflag [#allocation4], %s912_s15  ;;  %s653_s18 = scalar_lea.vmem %s944_s10, 128 }
  0x4e   : > { %497 = vmatprep.subr.mxu0 %v759_v8  ;;  %p654_p1 = scmp.ne.s32.totalorder %s944_s10, %s653_s18  ;;  %s761_s7 = smov [#allocation7]  }
  0x4f   : > { %498 = vmatpush3.msra.mxu0 %v279_v10  ;;  %s657_s28 = sshll.u32 %s761_s7, 4  ;;  %s658_s28 = int_to_ptr.vmem [resolvable:$false] %s657_s28 }
  0x50   : > { %499 = vmatprep.subr.mxu0 %v759_v8  ;;  %p655_p8 = pnand %p654_p1, %p875_p11  ;;  %s659_s11 = scalar_lea.vmem %s658_s28, 256 }
  0x51   : > { %500 = vmatpush3.msra.mxu0 %v278_v11  ;;  %p660_p2 = scmp.lt.s32.totalorder %s944_s10, %s658_s28  ;;  %p661_p0 = scmp.lt.s32.totalorder %s659_s11, %s653_s18 }
  0x52   : > { %s942_s6 = scalar_lea.hbm %s1024_s13, %s485_s26  ;;  %p656_p12 = pneg %p655_p8 }
  0x53   : > { %p662_p3 = por %p661_p0, %p660_p2 }
  0x55   : > { %p663_p5 = pnand %p662_p3, %p656_p12 }
  0xd4   : > { %v252_v2 = vpop.xlane.xlu0 %251 }
  0xd5   : > { %v254_v3 = vmul.f32 0.03125, %v252_v2 }
  0xd7   : > { %v255_v4 = vsub.f32 %v246_v0, %v254_v3 }
  0xd9   : > { %v256_v5 = vmul.f32 %v255_v4, %v255_v4 }
  0xdb   : > { %v257_v6 = vsel %vm249_vm0, %v256_v5, 0.0 }
  0xdc   : > { %258 = vadd.xlane.f32.xlu0 %v257_v6 }
 0x165   : > { %v259_v12 = vpop.xlane.xlu0 %258 }
 0x166   : > { %v260_v13 = vmul.f32 0.03125, %v259_v12 }
 0x168   : > { %v261_v14 = vadd.f32 1e-05, %v260_v13 }
 0x16a   : > { %597 = vrsqrt.f32 %v261_v14 }
 0x177   : > { %v598_v15 = vpop.eup %597 }
 0x178   : > { %v263_v17 = vmul.f32 %v598_v15, %v255_v4 }
 0x17a   : > { %v270_v19 = vmul.f32 %v480_v16, %v263_v17 }
 0x17c   : > { %v277_v20 = vadd.f32 %v481_v18, %v270_v19 }
 0x17e   : > { %502 = vmatmul.mubr.msk.f32.vlgmr.msra.gmra.mxu0 %vm249_vm0, %v277_v20 }
 0x23e   : > { %v351_v21 = vpop.f32.mrf.mxu0 }
 0x23f   : > { %356 = vst.msk [vmem:[%s245_s9] sm:$0xff] %vm355_vm2, %v351_v21 }
 0x240   : > { %v503_v22 = vpop.f32.mrf.mxu0 }
 0x241   : > { %666 = shalt.err (!%p663_p5)
}
 0x242   : > { %s667_s24 = scalar_lea.hbm %s942_s6, 128  ;;  %s671_s25 = scalar_lea.hbm %s1024_s13, 512 }
 0x243   : > { %p668_p4 = scmp.ne.s32.totalorder %s942_s6, %s667_s24  ;;  %p672_p9 = scmp.lt.s32.totalorder %s942_s6, %s1024_s13 }
 0x244   : > { %p673_p13 = scmp.lt.s32.totalorder %s671_s25, %s667_s24 }
 0x245   : > { %p669_p6 = pnand %p668_p4, %p875_p11 }
 0x246   : > { %p674_p10 = por %p673_p13, %p672_p9 }
 0x247   : > { %p670_p7 = pneg %p669_p6 }
 0x249   : > { %p675_p1 = pnand %p674_p10, %p670_p7 }
 0x24b   : > { %678 = shalt.err (!%p675_p1)
}
 0x24c   : > { %510 = dma.vmem_to_hbm [thread:$0]  (%p875_p11), %s944_s10, 128, %s942_s6, %s358_s19  }
 0x24d PF: > { %s1025_s30 = sld [smem:[#allocation11_spill]]  ;;  %p527_p8 = scmp.ge.s32.totalorder %s753_s22, 2 }
 0x24e   : > { %s1026_s8 = sld [smem:[#allocation12_spill]] }
 0x253   : > { %s385_s26 = sand.u32 1, %s1025_s30  }
 0x254   : > { %p1027_p12 = scmp.ne.s32.totalorder %s1026_s8, 0  ;;  %s386_s9 = scalar_lea.sflag [#allocation4], %s385_s26 }
 0x256   : > { %p521_p2 = pnand %p527_p8, %p1027_p12 }
 0x258   : > { %p522_p0 = pneg %p521_p2 }
 0x25a   : > { %720 = dma.done.wait (%p522_p0), %s386_s9, 128  }
 0x25b   : > { %722 = vsyncadd (%p522_p0), %s386_s9, 4294967168  ;;  %s21_s22 = sadd.s32 1, %s753_s22   ;;  %s1028_s23 = sld [smem:[#allocation13_spill]] }
 0x25c   : > { %p18_p3 = scmp.ge.s32.totalorder %s21_s22, 6   ;;  %s1029_s15 = smov %s729_s16 }
 0x25d   : > { %s1030_s16 = smov %s733_s17  ;;  %s1031_s17 = smov %s892_s3 }
 0x25e   : > { %s1032_s18 = smov %s745_s20  ;;  %s1033_s19 = smov %s749_s21 }
 0x25f   : > { %s1035_s21 = smov %s1041_s12  ;;  %20 = sbr.rel (!%p18_p3) target bundleno = 11 (0xb), region = 85 }
 0x261   : > { %s1034_s20 = smov %s1028_s23 }
 0x264   :  { %391 = vsyncpa [#allocation3], 1 }
 0x265   :  { %393 = vsyncpa [#allocation3 + $0x1], 1 }
 0x266   :  { %394 = vsyncpa [#allocation6], 1 }
 0x267   :  { %395 = vsyncpa [#allocation4], 1 }
 0x268   :  { %397 = vsyncpa [#allocation4 + $0x1], 1 }

// kernel: tpu_custom_call.1
= control target key start
LH: loop header
LB: loop body
LE: loop exit
PB: predicated region body
PF: predicated region fallthrough
CT: control target
= control target key end

     0   :  { %s995_s0 = inlined_call_operand.hbm [shape: f32[2,16,32], index: 0, kind: input, shape index: {}]   ;;  %s996_s1 = inlined_call_operand.vmem [shape: f32[1,32], index: 1, kind: input, shape index: {}]   ;;  %s997_s2 = inlined_call_operand.vmem [shape: f32[1,32], index: 2, kind: input, shape index: {}]   ;;  %s998_s3 = inlined_call_operand.hbm [shape: f32[32,96], index: 3, kind: input, shape index: {}]   ;;  %s999_s4 = inlined_call_operand.hbm [shape: f32[2,16,96], index: 4, kind: output, shape index: {}]  }
   0x1   :  { %1007 = sst [smem:[#allocation15_spill]] %s998_s3 }
   0x2   :  { %1008 = sst [smem:[#allocation16_spill]] %s999_s4 }
   0x3   :  { %9 = vsyncpa [#allocation3], 0 }
   0x4   :  { %11 = vsyncpa [#allocation3 + $0x1], 0 }
   0x5   :  { %12 = vsyncpa [#allocation6], 0 }
   0x6   :  { %13 = vsyncpa [#allocation4], 0 }
   0x7   :  { %15 = vsyncpa [#allocation4 + $0x1], 0  ;;  %s787_s15 = smov 0   ;;  %s789_s16 = smov 0  }
   0x8   :  { %s791_s17 = smov 0   ;;  %s793_s18 = smov 0  }
   0x9   :  { %s795_s19 = smov 0   ;;  %s797_s20 = smov 0  }
   0xa   :  { %s799_s21 = smov 0   ;;  %s801_s22 = smov 0  }
   0xb LB: > { %1009 = sst [smem:[#allocation11_spill]] %s725_s15  ;;  %s468_s23 = sadd.s32 4294967295, %s753_s22   ;;  %s753_s22 = sphi %s801_s22, %s21_s22   ;;  %s749_s21 = sphi %s799_s21, %s1035_s21   ;;  %s745_s20 = sphi %s797_s20, %s1034_s20   ;;  %s741_s19 = sphi %s795_s19, %s1033_s19   ;;  %s737_s18 = sphi %s793_s18, %s1032_s18   ;;  %s733_s17 = sphi %s791_s17, %s1031_s17   ;;  %s729_s16 = sphi %s789_s16, %s1030_s16   ;;  %s725_s15 = sphi %s787_s15, %s1029_s15  }
   0xc   : > { %s469_s24 = sadd.s32 4294967294, %s753_s22   ;;  %p55_p0 = scmp.ne.s32.totalorder %s729_s16, %s725_s15 }
   0xd   : > { %p831_p1 = scmp.eq.s32.totalorder %s468_s23, 0  ;;  %p835_p2 = scmp.eq.s32.totalorder %s468_s23, 3 }
   0xe   : > { %p150_p3 = scmp.eq.s32.totalorder %s469_s24, 3  ;;  %p470_p5 = scmp.ge.s32.totalorder %s753_s22, 1 }
   0xf   : > { %p841_p4 = por %p831_p1, %p55_p0  ;;  %p157_p7 = scmp.lt.s32.totalorder %s753_s22, 5 }
  0x10   : > { %p846_p6 = por %p150_p3, %p55_p0  ;;  %s755_s30 = smov [#allocation5]  }
  0x11   : > { %s1012_s27 = scalar_select %p841_p4, 1, 0 }
  0x12   : > { %s1013_s28 = scalar_select %p846_p6, 1, 0 }
  0x13   : > { %p851_p8 = pnand %p470_p5, %p157_p7  ;;  %s175_s5 = sshll.u32 %s755_s30, 4  ;;  %s176_s5 = int_to_ptr.vmem [resolvable:$true] %s175_s5 }
  0x14   : > { %1014 = sst [smem:[#allocation12_spill]] %s1013_s28  ;;  %s610_s6 = scalar_lea.vmem %s176_s5, 512 }
  0x15   : > { %p512_p9 = pneg %p851_p8  ;;  %p611_p12 = scmp.ne.s32.totalorder %s176_s5, %s610_s6 }
  0x16   : > { %p618_p3 = scmp.lt.s32.totalorder %s176_s5, %s176_s5  ;;  %p619_p6 = scmp.lt.s32.totalorder %s610_s6, %s610_s6 }
  0x17   : > { %p513_p10 = pnand %p512_p9, %p831_p1 }
  0x18   : > { %p620_p4 = por %p619_p6, %p618_p3 }
  0x19   : > { %p601_p11 = pneg %p513_p10 }
  0x1b   : > { %p613_p13 = pnand %p611_p12, %p601_p11 }
  0x1d   : > { %p614_p0 = pneg %p613_p13 }
  0x1f   : > { %p621_p5 = pnand %p620_p4, %p614_p0 }
  0x21   : > { %624 = shalt.err (!%p621_p5)
}
  0x22   : > { %s756_s7 = smov 128   ;;  %s757_s8 = smov 8  }
  0x23   : > { %s1016_s3 = sld [smem:[#allocation15_spill]]  ;;  %s30_s11 = sadd.s32 1, %s745_s20 }
  0x24   : > { %p31_p4 = scmp.ge.s32.totalorder %s30_s11, 2  ;;  %s33_s12 = sadd.s32 1, %s749_s21 }
  0x25   : > { %s42_s13 = sadd.s32 1, %s733_s17  ;;  %p49_p6 = scmp.ne.s32.totalorder %s733_s17, %s729_s16 }
  0x26   : > { %s1037_s11 = smov (%p31_p4, %s30_s11), 0  ;;  %s1039_s12 = smov (!%p31_p4, %s33_s12), %s749_s21 }
  0x27   : > { %1017 = sst [smem:[#allocation13_spill]] %s1037_s11  ;;  %s38_s14 = ssub.s32 %s745_s20, %s1037_s11 }
  0x28   : > { %p50_p7 = scmp.eq.s32.totalorder %s753_s22, 0  ;;  %p35_p9 = scmp.ge.s32.totalorder %s1039_s12, 2 }
  0x29   : > { %515 = dma.hbm_to_vmem [thread:$0]  (!%p513_p10), %s1016_s3, 512, %s176_s5, [#allocation6], %s756_s7, %s756_s7, %s757_s8  }
  0x2a   : > { %p875_p11 = por %p835_p2, %p49_p6  ;;  %p879_p10 = por %p50_p7, %p49_p6 }
  0x2b   : > { %p525_p12 = scmp.lt.s32.totalorder %s753_s22, 4  ;;  %s1041_s12 = smov (%p35_p9, %s1039_s12), 0 }
  0x2c   : > { %s1018_s23 = scalar_select %p875_p11, 1, 0 }
  0x2d   : > { %s189_s30 = sand.u32 1, %s733_s17   ;;  %s474_s5 = sshll.u32 %s749_s21, 1 }
  0x2e   : > { %1019 = sst [smem:[#allocation14_spill]] %s1018_s23  ;;  %s37_s6 = ssub.s32 %s749_s21, %s1041_s12 }
  0x2f   : > { %s39_s7 = sor.u32 %s38_s14, %s37_s6  ;;  %s473_s8 = sshll.u32 %s189_s30, 3 }
  0x30   : > { %p40_p13 = scmp.eq.s32.totalorder %s39_s7, 0  ;;  %s198_s26 = sadd.s32 %s745_s20, %s474_s5 }
  0x31   : > { %s193_s9 = scalar_lea.vmem [#allocation2], %s473_s8  ;;  %s475_s11 = sshll.u32 %s198_s26, 7 }
  0x32   : > { %s202_s10 = sshll.u32 %s193_s9, 4  ;;  %s200_s4 = scalar_lea.hbm %s995_s0, %s475_s11  ;;  %s203_s10 = int_to_ptr.vmem [resolvable:$true] %s202_s10 }
  0x33   : > { %s892_s3 = scalar_select %p40_p13, %s733_s17, %s42_s13  }
  0x34   : > { %p901_p2 = pnand %p525_p12, %p879_p10  ;;  %s190_s14 = scalar_lea.sflag [#allocation3], %s189_s30 }
  0x35   : > { %s638_s5 = scalar_lea.vmem %s203_s10, 128  ;;  %s758_s13 = smov [#allocation2]  }
  0x36   : > { %p627_p0 = pneg %p901_p2  ;;  %p639_p3 = scmp.ne.s32.totalorder %s203_s10, %s638_s5 }
  0x37   : > { %s643_s6 = sshll.u32 %s758_s13, 4  ;;  %s644_s6 = int_to_ptr.vmem [resolvable:$false] %s643_s6 }
  0x38   : > { %p641_p5 = pnand %p639_p3, %p627_p0  ;;  %s645_s7 = scalar_lea.vmem %s644_s6, 256 }
  0x39   : > { %p646_p6 = scmp.lt.s32.totalorder %s203_s10, %s644_s6  ;;  %p647_p7 = scmp.lt.s32.totalorder %s645_s7, %s638_s5 }
  0x3a   : > { %p642_p4 = pneg %p641_p5 }
  0x3b   : > { %p648_p9 = por %p647_p7, %p646_p6 }
  0x3d   : > { %p649_p13 = pnand %p648_p9, %p642_p4 }
  0x3f   : > { %652 = shalt.err (!%p649_p13)
}
  0x40   : > { %519 = dma.hbm_to_vmem [thread:$0]  (!%p901_p2), %s200_s4, 128, %s203_s10, %s190_s14  }
  0x41   : > { %211 = sbr.rel (%p851_p8) target bundleno = 589 (0x24d), region = 36  ;;  %s912_s15 = sand.u32 (!%p851_p8), 1, %s729_s16  }
  0x42   : > { %s477_s28 = sshll.u32 (!%p851_p8), %s912_s15, 3  ;;  %s214_s11 = scalar_lea.sflag (!%p851_p8), [#allocation3], %s912_s15 }
  0x43   : > { %s217_s24 = scalar_lea.vmem (!%p851_p8), [#allocation2], %s477_s28  ;;  %p1022_p10 = scmp.ne.s32.totalorder (!%p851_p8), %s1012_s27, 0 }
  0x46   : > { %712 = dma.done.wait (%p1022_p10), %s214_s11, 128  }
  0x47   : > { %714 = vsyncadd (%p1022_p10), %s214_s11, 4294967168 }
  0x48   : > { %716 = dma.done.wait (%p831_p1), [#allocation6], 512  }
  0x49   : > { %718 = vsyncadd (%p831_p1), [#allocation6], 4294966784  ;;  %vm249_vm0 = vcmask 261120   ;;  %v246_v0 = vld [vmem:[%s217_s24] sm:$0xff]  ;;  %v759_v8 = vmov 0.0   ;;  %vm760_vm1 = vmmov 0  }
  0x4a   : > { %v250_v1 = vsel %vm249_vm0, %v246_v0, 0.0  ;;  %v281_v7 = vld [vmem:[#allocation5 + $0x18] sm:$0xff]  ;;  %493 = vmatprep.subr.mxu0 %v759_v8  ;;  %v280_v9 = vld [vmem:[#allocation5 + $0x10] sm:$0xff]  ;;  %501 = vmatprep.mubr.msk.f32.mxu0 %vm760_vm1, %v759_v8  ;;  %v279_v10 = vld [vmem:[#allocation5 + $0x8] sm:$0xff]  ;;  %s484_s30 = sshll.u32 %s741_s19, 1  ;;  %s245_s9 = scalar_lea.vmem [#allocation7], %s477_s28 }
  0x4b   : > { %251 = vadd.xlane.f32.xlu0 %v250_v1  ;;  %494 = vmatpush3.msra.mxu0 %v281_v7  ;;  %v278_v11 = vld [vmem:[#allocation5] sm:$0xff]  ;;  %v480_v16 = vld [vmem:[%s996_s1] ss:$0 sm:$0xff]  ;;  %s369_s8 = sadd.s32 %s737_s18, %s484_s30  ;;  %s373_s10 = sshll.u32 %s245_s9, 4  ;;  %vm355_vm2 = vcmask 785408   ;;  %s944_s10 = int_to_ptr.vmem [resolvable:$true] %s373_s10 }
  0x4c   : > { %495 = vmatprep.subr.mxu0 %v759_v8  ;;  %v481_v18 = vld [vmem:[%s997_s2] ss:$0 sm:$0xff]  ;;  %s485_s26 = sshll.u32 %s369_s8, 7  ;;  %s1024_s13 = sld [smem:[#allocation16_spill]] }
  0x4d   : > { %496 = vmatpush3.msra.mxu0 %v280_v9  ;;  %s358_s19 = scalar_lea.sflag [#allocation4], %s912_s15  ;;  %s653_s18 = scalar_lea.vmem %s944_s10, 128 }
  0x4e   : > { %497 = vmatprep.subr.mxu0 %v759_v8  ;;  %p654_p1 = scmp.ne.s32.totalorder %s944_s10, %s653_s18  ;;  %s761_s7 = smov [#allocation7]  }
  0x4f   : > { %498 = vmatpush3.msra.mxu0 %v279_v10  ;;  %s657_s28 = sshll.u32 %s761_s7, 4  ;;  %s658_s28 = int_to_ptr.vmem [resolvable:$false] %s657_s28 }
  0x50   : > { %499 = vmatprep.subr.mxu0 %v759_v8  ;;  %p655_p8 = pnand %p654_p1, %p875_p11  ;;  %s659_s11 = scalar_lea.vmem %s658_s28, 256 }
  0x51   : > { %500 = vmatpush3.msra.mxu0 %v278_v11  ;;  %p660_p2 = scmp.lt.s32.totalorder %s944_s10, %s658_s28  ;;  %p661_p0 = scmp.lt.s32.totalorder %s659_s11, %s653_s18 }
  0x52   : > { %s942_s6 = scalar_lea.hbm %s1024_s13, %s485_s26  ;;  %p656_p12 = pneg %p655_p8 }
  0x53   : > { %p662_p3 = por %p661_p0, %p660_p2 }
  0x55   : > { %p663_p5 = pnand %p662_p3, %p656_p12 }
  0xd4   : > { %v252_v2 = vpop.xlane.xlu0 %251 }
  0xd5   : > { %v254_v3 = vmul.f32 0.03125, %v252_v2 }
  0xd7   : > { %v255_v4 = vsub.f32 %v246_v0, %v254_v3 }
  0xd9   : > { %v256_v5 = vmul.f32 %v255_v4, %v255_v4 }
  0xdb   : > { %v257_v6 = vsel %vm249_vm0, %v256_v5, 0.0 }
  0xdc   : > { %258 = vadd.xlane.f32.xlu0 %v257_v6 }
 0x165   : > { %v259_v12 = vpop.xlane.xlu0 %258 }
 0x166   : > { %v260_v13 = vmul.f32 0.03125, %v259_v12 }
 0x168   : > { %v261_v14 = vadd.f32 1e-05, %v260_v13 }
 0x16a   : > { %597 = vrsqrt.f32 %v261_v14 }
 0x177   : > { %v598_v15 = vpop.eup %597 }
 0x178   : > { %v263_v17 = vmul.f32 %v598_v15, %v255_v4 }
 0x17a   : > { %v270_v19 = vmul.f32 %v480_v16, %v263_v17 }
 0x17c   : > { %v277_v20 = vadd.f32 %v481_v18, %v270_v19 }
 0x17e   : > { %502 = vmatmul.mubr.msk.f32.vlgmr.msra.gmra.mxu0 %vm249_vm0, %v277_v20 }
 0x23e   : > { %v351_v21 = vpop.f32.mrf.mxu0 }
 0x23f   : > { %356 = vst.msk [vmem:[%s245_s9] sm:$0xff] %vm355_vm2, %v351_v21 }
 0x240   : > { %v503_v22 = vpop.f32.mrf.mxu0 }
 0x241   : > { %666 = shalt.err (!%p663_p5)
}
 0x242   : > { %s667_s24 = scalar_lea.hbm %s942_s6, 128  ;;  %s671_s25 = scalar_lea.hbm %s1024_s13, 512 }
 0x243   : > { %p668_p4 = scmp.ne.s32.totalorder %s942_s6, %s667_s24  ;;  %p672_p9 = scmp.lt.s32.totalorder %s942_s6, %s1024_s13 }
 0x244   : > { %p673_p13 = scmp.lt.s32.totalorder %s671_s25, %s667_s24 }
 0x245   : > { %p669_p6 = pnand %p668_p4, %p875_p11 }
 0x246   : > { %p674_p10 = por %p673_p13, %p672_p9 }
 0x247   : > { %p670_p7 = pneg %p669_p6 }
 0x249   : > { %p675_p1 = pnand %p674_p10, %p670_p7 }
 0x24b   : > { %678 = shalt.err (!%p675_p1)
}
 0x24c   : > { %510 = dma.vmem_to_hbm [thread:$0]  (%p875_p11), %s944_s10, 128, %s942_s6, %s358_s19  }
 0x24d PF: > { %s1025_s30 = sld [smem:[#allocation11_spill]]  ;;  %p527_p8 = scmp.ge.s32.totalorder %s753_s22, 2 }
 0x24e   : > { %s1026_s8 = sld [smem:[#allocation12_spill]] }
 0x253   : > { %s385_s26 = sand.u32 1, %s1025_s30  }
 0x254   : > { %p1027_p12 = scmp.ne.s32.totalorder %s1026_s8, 0  ;;  %s386_s9 = scalar_lea.sflag [#allocation4], %s385_s26 }
 0x256   : > { %p521_p2 = pnand %p527_p8, %p1027_p12 }
 0x258   : > { %p522_p0 = pneg %p521_p2 }
 0x25a   : > { %720 = dma.done.wait (%p522_p0), %s386_s9, 128  }
 0x25b   : > { %722 = vsyncadd (%p522_p0), %s386_s9, 4294967168  ;;  %s21_s22 = sadd.s32 1, %s753_s22   ;;  %s1028_s23 = sld [smem:[#allocation13_spill]] }
 0x25c   : > { %p18_p3 = scmp.ge.s32.totalorder %s21_s22, 6   ;;  %s1029_s15 = smov %s729_s16 }
 0x25d   : > { %s1030_s16 = smov %s733_s17  ;;  %s1031_s17 = smov %s892_s3 }
 0x25e   : > { %s1032_s18 = smov %s745_s20  ;;  %s1033_s19 = smov %s749_s21 }
 0x25f   : > { %s1035_s21 = smov %s1041_s12  ;;  %20 = sbr.rel (!%p18_p3) target bundleno = 11 (0xb), region = 85 }
 0x261   : > { %s1034_s20 = smov %s1028_s23 }
 0x264   :  { %391 = vsyncpa [#allocation3], 1 }
 0x265   :  { %393 = vsyncpa [#allocation3 + $0x1], 1 }
 0x266   :  { %394 = vsyncpa [#allocation6], 1 }
 0x267   :  { %395 = vsyncpa [#allocation4], 1 }
 0x268   :  { %397 = vsyncpa [#allocation4 + $0x1], 1 }

</bundles_post_ra>
